<compile_context>
chip_gen: v7x
topology: tpu7x:2x2x1
jax: 0.10.0
libtpu: 0.0.40
codegen_flags: <defaults>
</compile_context>

<pallas_src>
import math

import jax
import jax.numpy as jnp
from jax.experimental import pallas as pl
from jax.experimental.pallas import tpu as pltpu

# Constants matching the reference Hyperboloid manifold (float32, c = 1.0).
EPS = 1e-7        # Hyperboloid.eps[torch.float32]
MIN_NORM = 1e-15
MAX_NORM = 1e6
NEG_BIG = -1e30   # used to mask padded columns out of the final log_softmax

VMEM_BUDGET = 24 * 1024 * 1024   # per-step live-bytes target (safe on v7x 32 MiB scoped)
VMEM_LIMIT = 32 * 1024 * 1024    # explicit scoped-VMEM limit for every pallas_call


def _round_up(x, m):
    return ((x + m - 1) // m) * m


# ---------------------------------------------------------------------------
# In-kernel manifold helpers (f32 VMEM data, col 0 = time-like coordinate).
# All helpers assume padded feature columns are exactly zero.
# ---------------------------------------------------------------------------
def _sinh_cosh(t):
    # one exp pair instead of jnp.sinh + jnp.cosh (halves EUP transcendental count)
    e = jnp.exp(t)
    em = jnp.exp(-t)
    return 0.5 * (e - em), 0.5 * (e + em)


def _arcosh(t):
    return jnp.log(t + jnp.sqrt(jnp.maximum(t * t - 1.0, 0.0)))


def _expmap0_proj(u, col0):
    """proj(expmap0(u)), c=1, assuming u[:, 0] == 0 and padded cols == 0."""
    nrm = jnp.maximum(jnp.sqrt(jnp.sum(u * u, axis=-1, keepdims=True)), MIN_NORM)
    inv = pl.reciprocal(nrm, approx=True)
    sh, ch = _sinh_cosh(nrm)
    return jnp.where(col0, ch, (sh * inv) * u)


def _logmap0(x, col0):
    """logmap0(x), c=1. Result is a tangent vector with col 0 == 0."""
    x0 = x[:, 0:1]
    y = jnp.where(col0, 0.0, x)
    ynorm = jnp.maximum(jnp.sqrt(jnp.sum(y * y, axis=-1, keepdims=True)), MIN_NORM)
    theta = jnp.maximum(x0, 1.0 + EPS)
    scale = _arcosh(theta) * pl.reciprocal(ynorm, approx=True)
    return scale * y            # y already has col0 == 0 and padded cols == 0


def _mobius_add_bias(x, tb, col0):
    """mobius_add(x, hyp_bias), c=1, with tb == proj_tan0(b) == logmap0(hyp_bias)."""
    # ptransp0(x, tb)
    x0 = x[:, 0:1]
    y = jnp.where(col0, 0.0, x)
    ynorm = jnp.maximum(jnp.sqrt(jnp.sum(y * y, axis=-1, keepdims=True)), MIN_NORM)
    yhat = y * pl.reciprocal(ynorm, approx=True)
    v = jnp.where(col0, -ynorm, (1.0 - x0) * yhat)
    alpha = jnp.sum(yhat * tb, axis=-1, keepdims=True)   # yhat[:,0]==0 -> no masking
    u = tb - alpha * v
    # proj_tan(u, x): sum_{j>0} y_j*u_j == alpha*ynorm*x0 (saves one XLU reduce)
    ux = alpha * ynorm * x0
    u = jnp.where(col0, ux / jnp.maximum(x0, EPS), u)
    # expmap(u, x)
    u0 = u[:, 0:1]
    mdot = jnp.sum(u * u, axis=-1, keepdims=True) - 2.0 * u0 * u0
    normu = jnp.minimum(jnp.sqrt(jnp.maximum(mdot, EPS)), MAX_NORM)
    theta = jnp.maximum(normu, MIN_NORM)
    sh, ch = _sinh_cosh(theta)
    res = ch * x + (sh * pl.reciprocal(theta, approx=True)) * u
    # proj(res)
    r = jnp.where(col0, 0.0, res)
    r0 = jnp.sqrt(jnp.maximum(1.0 + jnp.sum(r * r, axis=-1, keepdims=True), EPS))
    return jnp.where(col0, r0, res)


# ---------------------------------------------------------------------------
# Kernel A: HypLinear (mobius matvec + hyperbolic bias add) + HypAgg's logmap0.
# Grid: node row blocks ("parallel").
# ---------------------------------------------------------------------------
def _linear_logmap_kernel(u_ref, wt_ref, tb_ref, t_ref):
    u = u_ref[...]                       # (bn, F_pad) tangent, col0 & pads == 0
    wt = wt_ref[...]                     # (F_pad, H_pad) bf16, column 0 zeroed
    tb = tb_ref[...]                     # (1, H_pad) f32 tangent bias (col0 == 0)
    rows, cols = u.shape[0], wt.shape[1]
    col0 = jax.lax.broadcasted_iota(jnp.int32, (rows, cols), 1) == 0  # hoisted mask

    mu = jnp.dot(u, wt, preferred_element_type=jnp.float32)  # MXU, f32 accumulate
    h = _expmap0_proj(mu, col0)          # HypLinear: res = proj(mobius_matvec(...))
    h = _mobius_add_bias(h, tb, col0)    # HypLinear: hyperbolic bias add
    t = _logmap0(h, col0)                # HypAgg front half: tangent for adj matmul
    t_ref[...] = t.astype(t_ref.dtype)


def _hyp_linear_logmap(u, wt, tb, bn):
    n_pad = u.shape[0]
    f_pad, h_pad = wt.shape
    return pl.pallas_call(
        _linear_logmap_kernel,
        out_shape=jax.ShapeDtypeStruct((n_pad, h_pad), jnp.bfloat16),
        grid=(n_pad // bn,),
        in_specs=[
            pl.BlockSpec((bn, f_pad), lambda i: (i, 0)),
            pl.BlockSpec((f_pad, h_pad), lambda i: (0, 0)),
            pl.BlockSpec((1, h_pad), lambda i: (0, 0)),
        ],
        out_specs=pl.BlockSpec((bn, h_pad), lambda i: (i, 0)),
        compiler_params=pltpu.CompilerParams(
            dimension_semantics=("parallel",),
            vmem_limit_bytes=VMEM_LIMIT),
    )(u, wt, tb)


# ---------------------------------------------------------------------------
# Kernel B: HypAgg (adj @ tangent) + HypAct (relu in tangent space); on the last
# layer also the decode + log_softmax (the expmap0/logmap0 round-trips between
# agg/act/decode are identities on tangent vectors and are elided).
# Preferred path: single full-K block per row block (no accumulator, no phases).
# Fallback path: ("parallel", "arbitrary") grid with a large K tile + VMEM acc.
# ---------------------------------------------------------------------------
def _epilogue(a, last_layer, n_valid_cols, out_dtype):
    a = jnp.maximum(a, 0.0)              # relu in tangent space (HypAct)
    if not last_layer:
        return a.astype(out_dtype)
    valid = jax.lax.broadcasted_iota(jnp.int32, a.shape, 1) < n_valid_cols
    z = jnp.where(valid, a, NEG_BIG)
    z = z - jnp.max(z, axis=-1, keepdims=True)
    ez = jnp.where(valid, jnp.exp(z), 0.0)
    lse = jnp.log(jnp.sum(ez, axis=-1, keepdims=True))
    return (z - lse).astype(out_dtype)


def _make_agg_fullk_kernel(last_layer, n_valid_cols):
    def kernel(adj_ref, t_ref, o_ref):
        acc = jnp.dot(adj_ref[...], t_ref[...], preferred_element_type=jnp.float32)
        o_ref[...] = _epilogue(acc, last_layer, n_valid_cols, o_ref.dtype)
    return kernel


def _make_agg_ktiled_kernel(last_layer, n_valid_cols):
    def kernel(adj_ref, t_ref, o_ref, acc_ref):
        k = pl.program_id(1)

        @pl.when(k == 0)
        def _():
            acc_ref[...] = jnp.zeros_like(acc_ref)

        acc_ref[...] += jnp.dot(adj_ref[...], t_ref[...],
                                preferred_element_type=jnp.float32)

        @pl.when(k == pl.num_programs(1) - 1)
        def _():
            o_ref[...] = _epilogue(acc_ref[...], last_layer, n_valid_cols, o_ref.dtype)

    return kernel


def _hyp_agg_act(adj, t, bn, bk, last_layer=False, n_valid_cols=0):
    n_pad = adj.shape[0]
    h_pad = t.shape[1]
    out_dtype = jnp.float32 if last_layer else jnp.bfloat16

    if bk >= n_pad:
        # Full-K row slab: one DMA'd (bn, n_pad) adj tile per step, direct store.
        return pl.pallas_call(
            _make_agg_fullk_kernel(last_layer, n_valid_cols),
            out_shape=jax.ShapeDtypeStruct((n_pad, h_pad), out_dtype),
            grid=(n_pad // bn,),
            in_specs=[
                pl.BlockSpec((bn, n_pad), lambda i: (i, 0)),
                pl.BlockSpec((n_pad, h_pad), lambda i: (0, 0)),
            ],
            out_specs=pl.BlockSpec((bn, h_pad), lambda i: (i, 0)),
            compiler_params=pltpu.CompilerParams(
                dimension_semantics=("parallel",),
                vmem_limit_bytes=VMEM_LIMIT),
        )(adj, t)

    # Large-graph fallback: K-tiled with a big bk derived from the VMEM budget.
    return pl.pallas_call(
        _make_agg_ktiled_kernel(last_layer, n_valid_cols),
        out_shape=jax.ShapeDtypeStruct((n_pad, h_pad), out_dtype),
        grid=(n_pad // bn, n_pad // bk),
        in_specs=[
            pl.BlockSpec((bn, bk), lambda i, k: (i, k)),
            pl.BlockSpec((bk, h_pad), lambda i, k: (k, 0)),
        ],
        out_specs=pl.BlockSpec((bn, h_pad), lambda i, k: (i, 0)),
        scratch_shapes=[pltpu.VMEM((bn, h_pad), jnp.float32)],
        compiler_params=pltpu.CompilerParams(
            dimension_semantics=("parallel", "arbitrary"),
            vmem_limit_bytes=VMEM_LIMIT),
    )(adj, t)


# ---------------------------------------------------------------------------
# Tiling selection + cacheable packing + forward.
# ---------------------------------------------------------------------------
def choose_tiling(n, h_pad_max):
    """Pick (bn, bk, n_pad). Guarantees >=2 row blocks (v7x megacore) and keeps
    per-step live VMEM under VMEM_BUDGET (v7x 64 MiB physical / 32 MiB scoped)."""
    if n <= 256:
        bn = max(16, _round_up(n, 16))
        n_pad = 2 * bn                      # >= 2 "parallel" row blocks
    else:
        bn = 512
        n_pad = _round_up(n, bn)
        if n_pad // bn < 2:
            n_pad = 2 * bn

    # Full-K aggregation if the (bn, n_pad) f32 adj slab (double-buffered) fits.
    full_bytes = 8 * bn * n_pad + 8 * n_pad * h_pad_max + 8 * bn * h_pad_max
    if full_bytes <= VMEM_BUDGET:
        bk = n_pad
    else:
        q = (VMEM_BUDGET - 12 * bn * h_pad_max) // (8 * (bn + h_pad_max)) // bn
        bk = max(1, q) * bn                 # large K tile, multiple of bn
        n_pad = _round_up(n_pad, bk)        # zero rows/cols are harmless
    return bn, bk, n_pad


def pack_graph(x, adj, n_pad, f_pad):
    """Per-graph packing (cache this across forwards). proj_tan0(x) + the prologue
    expmap0->proj->logmap0 round-trip are folded into the zero-padding of col 0."""
    n, f0 = x.shape
    x_p = jnp.zeros((n_pad, f_pad), jnp.bfloat16).at[:n, 1:f0].set(
        x[:, 1:].astype(jnp.bfloat16))
    adj_p = jnp.zeros((n_pad, n_pad), jnp.float32).at[:n, :n].set(
        adj.astype(jnp.float32))            # adj kept in f32 (edge-weight precision)
    return x_p, adj_p


def pack_params(w1, b1, w2, b2, f_pad, h_pad, c_pad):
    """Per-model packing (cache this across forwards)."""
    f32, bf16 = jnp.float32, jnp.bfloat16
    h_dim, f0 = w1.shape
    c_dim = w2.shape[0]
    # W^T zero-padded; time-like output column zeroed (expmap0 discards mu[:, 0]).
    w1t = jnp.zeros((f_pad, h_pad), f32).at[:f0, :h_dim].set(w1.T.astype(f32))
    w1t = w1t.at[:, 0].set(0.0).astype(bf16)
    w2t = jnp.zeros((h_pad, c_pad), f32).at[:h_dim, :c_dim].set(w2.T.astype(f32))
    w2t = w2t.at[:, 0].set(0.0).astype(bf16)
    # Tangent biases: logmap0(proj(expmap0(proj_tan0(b)))) == proj_tan0(b).
    tb1 = jnp.zeros((1, h_pad), f32).at[0, 1:h_dim].set(b1[1:].astype(f32))
    tb2 = jnp.zeros((1, c_pad), f32).at[0, 1:c_dim].set(b2[1:].astype(f32))
    return w1t, tb1, w2t, tb2


def hgcn_forward_packed(x_p, adj_p, w1t, tb1, w2t, tb2, *, bn, bk, n, c_dim):
    """Steady-state forward on pre-packed (cached) graph/model tensors."""
    t1 = _hyp_linear_logmap(x_p, w1t, tb1, bn)                  # layer 1 HypLinear
    a1 = _hyp_agg_act(adj_p, t1, bn, bk)                        # layer 1 HypAgg+HypAct
    t2 = _hyp_linear_logmap(a1, w2t, tb2, bn)                   # layer 2 HypLinear
    out = _hyp_agg_act(adj_p, t2, bn, bk,
                       last_layer=True, n_valid_cols=c_dim)     # layer 2 + log_softmax
    return out[:n, :c_dim]


def hgcn_forward(x, adj, w1, b1, w2, b2):
    """One-shot convenience wrapper. x: (N, F0), adj: (N, N), w1: (H, F0), b1: (H,),
    w2: (C, H), b2: (C,)."""
    n, f0 = x.shape
    h_dim = w1.shape[0]
    c_dim = w2.shape[0]
    f_pad = _round_up(f0, 128)              # lane-dense feature dims
    h_pad = _round_up(h_dim, 128)
    c_pad = _round_up(c_dim, 128)
    bn, bk, n_pad = choose_tiling(n, max(h_pad, c_pad))

    x_p, adj_p = pack_graph(x, adj, n_pad, f_pad)
    w1t, tb1, w2t, tb2 = pack_params(w1, b1, w2, b2, f_pad, h_pad, c_pad)
    return hgcn_forward_packed(x_p, adj_p, w1t, tb1, w2t, tb2,
                               bn=bn, bk=bk, n=n, c_dim=c_dim)


# ---------------------------------------------------------------------------
if __name__ == "__main__":
    key = jax.random.PRNGKey(0)
    # small shapes consistent with the forward (original: 1433 -> 100 -> 7)
    N, F0, H, C = 16, 32, 16, 8
    k1, k2, k3, k4, k5, k6 = jax.random.split(key, 6)

    x = 0.1 * jax.random.normal(k1, (N, F0), jnp.float32)

    # symmetric adjacency with self loops, row-normalized
    a = (jax.random.uniform(k2, (N, N)) < 0.3).astype(jnp.float32)
    a = jnp.maximum(a, a.T) + jnp.eye(N, dtype=jnp.float32)
    adj = a / jnp.sum(a, axis=1, keepdims=True)

    # HypLinear params: weight (out, in) xavier_uniform(gain=sqrt(2)), bias (out,)
    def xavier(k, shape, gain):
        fan_out, fan_in = shape
        bound = gain * math.sqrt(6.0 / (fan_in + fan_out))
        return jax.random.uniform(k, shape, jnp.float32, -bound, bound)

    w1 = xavier(k3, (H, F0), math.sqrt(2.0))
    w2 = xavier(k4, (C, H), math.sqrt(2.0))
    b1 = 0.01 * jax.random.normal(k5, (H,), jnp.float32)
    b2 = 0.01 * jax.random.normal(k6, (C,), jnp.float32)

    # Cached-packing path: pack once, then run the packed forward.
    f_pad = _round_up(F0, 128)
    h_pad = _round_up(H, 128)
    c_pad = _round_up(C, 128)
    bn, bk, n_pad = choose_tiling(N, max(h_pad, c_pad))
    x_p, adj_p = pack_graph(x, adj, n_pad, f_pad)
    packed_params = pack_params(w1, b1, w2, b2, f_pad, h_pad, c_pad)

    out = hgcn_forward_packed(x_p, adj_p, *packed_params,
                              bn=bn, bk=bk, n=N, c_dim=C)
    out = jax.block_until_ready(out)

    assert out.shape == (N, C)
    assert bool(jnp.all(jnp.isfinite(out)))
    print("KERNEL_OK")
</pallas_src>

<mosaic_0001>
module attributes {stable_mosaic.version = 11 : i64} {
  func.func @_linear_logmap_kernel(%arg0: i32, %arg1: memref<16x128xbf16, #tpu.memory_space<vmem>>, %arg2: memref<128x128xbf16, #tpu.memory_space<vmem>>, %arg3: memref<1x128xf32, #tpu.memory_space<vmem>>, %arg4: memref<16x128xbf16, #tpu.memory_space<vmem>>) attributes {dimension_semantics = [#tpu.dimension_semantics<parallel>], iteration_bounds = array<i64: 2>, scalar_prefetch = 0 : i64, scratch_operands = 0 : i64, tpu.core_type = #tpu.core_type<tc>, window_params = [{transform_indices = @transform_0, window_bounds = array<i64: 16, 128>}, {pipeline_mode = #tpu.pipeline_mode<synchronous>, transform_indices = @transform_1, window_bounds = array<i64: 128, 128>}, {pipeline_mode = #tpu.pipeline_mode<synchronous>, transform_indices = @transform_2, window_bounds = array<i64: 1, 128>}, {transform_indices = @transform_3, window_bounds = array<i64: 16, 128>}]} {
    %c0 = arith.constant 0 : index
    %c0_0 = arith.constant 0 : index
    %0 = vector.load %arg1[%c0, %c0_0] : memref<16x128xbf16, #tpu.memory_space<vmem>>, vector<16x128xbf16>
    %c0_1 = arith.constant 0 : index
    %c0_2 = arith.constant 0 : index
    %1 = vector.load %arg2[%c0_1, %c0_2] : memref<128x128xbf16, #tpu.memory_space<vmem>>, vector<128x128xbf16>
    %c0_3 = arith.constant 0 : index
    %c0_4 = arith.constant 0 : index
    %2 = vector.load %arg3[%c0_3, %c0_4] : memref<1x128xf32, #tpu.memory_space<vmem>>, vector<1x128xf32>
    %3 = tpu.iota {dimensions = array<i32: 1>} : vector<16x128xi32>
    %c0_i32 = arith.constant 0 : i32
    %4 = vector.broadcast %c0_i32 : i32 to vector<16x128xi32>
    %5 = arith.cmpi eq, %3, %4 : vector<16x128xi32>
    %cst = arith.constant dense<0.000000e+00> : vector<16x128xf32>
    %6 = tpu.matmul %0, %1, %cst {dimension_numbers = #tpu.dot_dimension_numbers<[1], [0], [0], [1], [0, 0, 1, 1], [], []>} : vector<16x128xbf16>, vector<128x128xbf16>, vector<16x128xf32> -> vector<16x128xf32>
    %7 = arith.mulf %6, %6 : vector<16x128xf32>
    %cst_5 = arith.constant dense<0.000000e+00> : vector<16xf32>
    %8 = vector.multi_reduction <add>, %7, %cst_5 [1] : vector<16x128xf32> to vector<16xf32>
    %9 = vector.shape_cast %8 : vector<16xf32> to vector<16x1xf32>
    %10 = math.sqrt %9 : vector<16x1xf32>
    %cst_6 = arith.constant 1.000000e-15 : f32
    %11 = vector.broadcast %cst_6 : f32 to vector<16x1xf32>
    %12 = arith.maximumf %10, %11 : vector<16x1xf32>
    %13 = tpu.reciprocal %12 {approx = true} : vector<16x1xf32> -> vector<16x1xf32>
    %14 = math.exp %12 : vector<16x1xf32>
    %cst_7 = arith.constant 0.000000e+00 : f32
    %15 = vector.broadcast %cst_7 : f32 to vector<16x1xf32>
    %16 = arith.subf %15, %12 : vector<16x1xf32>
    %17 = math.exp %16 : vector<16x1xf32>
    %18 = arith.subf %14, %17 : vector<16x1xf32>
    %cst_8 = arith.constant 5.000000e-01 : f32
    %19 = vector.broadcast %cst_8 : f32 to vector<16x1xf32>
    %20 = arith.mulf %19, %18 : vector<16x1xf32>
    %21 = arith.addf %14, %17 : vector<16x1xf32>
    %cst_9 = arith.constant 5.000000e-01 : f32
    %22 = vector.broadcast %cst_9 : f32 to vector<16x1xf32>
    %23 = arith.mulf %22, %21 : vector<16x1xf32>
    %24 = arith.mulf %20, %13 : vector<16x1xf32>
    %25 = vector.broadcast %24 : vector<16x1xf32> to vector<16x128xf32>
    %26 = arith.mulf %25, %6 : vector<16x128xf32>
    %27 = vector.shape_cast %23 : vector<16x1xf32> to vector<16x1xf32>
    %28 = vector.broadcast %27 : vector<16x1xf32> to vector<16x128xf32>
    %29 = arith.select %5, %28, %26 : vector<16x128xi1>, vector<16x128xf32>
    %30 = vector.extract_strided_slice %29 {offsets = [0, 0], sizes = [16, 1], strides = [1, 1]} : vector<16x128xf32> to vector<16x1xf32>
    %cst_10 = arith.constant 0.000000e+00 : f32
    %31 = vector.broadcast %cst_10 : f32 to vector<16x128xf32>
    %32 = arith.select %5, %31, %29 : vector<16x128xi1>, vector<16x128xf32>
    %33 = arith.mulf %32, %32 : vector<16x128xf32>
    %cst_11 = arith.constant dense<0.000000e+00> : vector<16xf32>
    %34 = vector.multi_reduction <add>, %33, %cst_11 [1] : vector<16x128xf32> to vector<16xf32>
    %35 = vector.shape_cast %34 : vector<16xf32> to vector<16x1xf32>
    %36 = math.sqrt %35 : vector<16x1xf32>
    %cst_12 = arith.constant 1.000000e-15 : f32
    %37 = vector.broadcast %cst_12 : f32 to vector<16x1xf32>
    %38 = arith.maximumf %36, %37 : vector<16x1xf32>
    %39 = tpu.reciprocal %38 {approx = true} : vector<16x1xf32> -> vector<16x1xf32>
    %40 = vector.broadcast %39 : vector<16x1xf32> to vector<16x128xf32>
    %41 = arith.mulf %32, %40 : vector<16x128xf32>
    %cst_13 = arith.constant 0.000000e+00 : f32
    %42 = vector.broadcast %cst_13 : f32 to vector<16x1xf32>
    %43 = arith.subf %42, %38 : vector<16x1xf32>
    %cst_14 = arith.constant 1.000000e+00 : f32
    %44 = vector.broadcast %cst_14 : f32 to vector<16x1xf32>
    %45 = arith.subf %44, %30 : vector<16x1xf32>
    %46 = vector.broadcast %45 : vector<16x1xf32> to vector<16x128xf32>
    %47 = arith.mulf %46, %41 : vector<16x128xf32>
    %48 = vector.shape_cast %43 : vector<16x1xf32> to vector<16x1xf32>
    %49 = vector.broadcast %48 : vector<16x1xf32> to vector<16x128xf32>
    %50 = arith.select %5, %49, %47 : vector<16x128xi1>, vector<16x128xf32>
    %51 = vector.broadcast %2 : vector<1x128xf32> to vector<16x128xf32>
    %52 = arith.mulf %41, %51 : vector<16x128xf32>
    %cst_15 = arith.constant dense<0.000000e+00> : vector<16xf32>
    %53 = vector.multi_reduction <add>, %52, %cst_15 [1] : vector<16x128xf32> to vector<16xf32>
    %54 = vector.shape_cast %53 : vector<16xf32> to vector<16x1xf32>
    %55 = vector.broadcast %54 : vector<16x1xf32> to vector<16x128xf32>
    %56 = arith.mulf %55, %50 : vector<16x128xf32>
    %57 = vector.broadcast %2 : vector<1x128xf32> to vector<16x128xf32>
    %58 = arith.subf %57, %56 : vector<16x128xf32>
    %59 = arith.mulf %54, %38 : vector<16x1xf32>
    %60 = arith.mulf %59, %30 : vector<16x1xf32>
    %cst_16 = arith.constant 1.000000e-07 : f32
    %61 = vector.broadcast %cst_16 : f32 to vector<16x1xf32>
    %62 = arith.maximumf %30, %61 : vector<16x1xf32>
    %63 = arith.divf %60, %62 : vector<16x1xf32>
    %64 = vector.shape_cast %63 : vector<16x1xf32> to vector<16x1xf32>
    %65 = vector.broadcast %64 : vector<16x1xf32> to vector<16x128xf32>
    %66 = arith.select %5, %65, %58 : vector<16x128xi1>, vector<16x128xf32>
    %67 = vector.extract_strided_slice %66 {offsets = [0, 0], sizes = [16, 1], strides = [1, 1]} : vector<16x128xf32> to vector<16x1xf32>
    %68 = arith.mulf %66, %66 : vector<16x128xf32>
    %cst_17 = arith.constant dense<0.000000e+00> : vector<16xf32>
    %69 = vector.multi_reduction <add>, %68, %cst_17 [1] : vector<16x128xf32> to vector<16xf32>
    %70 = vector.shape_cast %69 : vector<16xf32> to vector<16x1xf32>
    %cst_18 = arith.constant 2.000000e+00 : f32
    %71 = vector.broadcast %cst_18 : f32 to vector<16x1xf32>
    %72 = arith.mulf %71, %67 : vector<16x1xf32>
    %73 = arith.mulf %72, %67 : vector<16x1xf32>
    %74 = arith.subf %70, %73 : vector<16x1xf32>
    %cst_19 = arith.constant 1.000000e-07 : f32
    %75 = vector.broadcast %cst_19 : f32 to vector<16x1xf32>
    %76 = arith.maximumf %74, %75 : vector<16x1xf32>
    %77 = math.sqrt %76 : vector<16x1xf32>
    %cst_20 = arith.constant 1.000000e+06 : f32
    %78 = vector.broadcast %cst_20 : f32 to vector<16x1xf32>
    %79 = arith.minimumf %77, %78 : vector<16x1xf32>
    %cst_21 = arith.constant 1.000000e-15 : f32
    %80 = vector.broadcast %cst_21 : f32 to vector<16x1xf32>
    %81 = arith.maximumf %79, %80 : vector<16x1xf32>
    %82 = math.exp %81 : vector<16x1xf32>
    %cst_22 = arith.constant 0.000000e+00 : f32
    %83 = vector.broadcast %cst_22 : f32 to vector<16x1xf32>
    %84 = arith.subf %83, %81 : vector<16x1xf32>
    %85 = math.exp %84 : vector<16x1xf32>
    %86 = arith.subf %82, %85 : vector<16x1xf32>
    %cst_23 = arith.constant 5.000000e-01 : f32
    %87 = vector.broadcast %cst_23 : f32 to vector<16x1xf32>
    %88 = arith.mulf %87, %86 : vector<16x1xf32>
    %89 = arith.addf %82, %85 : vector<16x1xf32>
    %cst_24 = arith.constant 5.000000e-01 : f32
    %90 = vector.broadcast %cst_24 : f32 to vector<16x1xf32>
    %91 = arith.mulf %90, %89 : vector<16x1xf32>
    %92 = vector.broadcast %91 : vector<16x1xf32> to vector<16x128xf32>
    %93 = arith.mulf %92, %29 : vector<16x128xf32>
    %94 = tpu.reciprocal %81 {approx = true} : vector<16x1xf32> -> vector<16x1xf32>
    %95 = arith.mulf %88, %94 : vector<16x1xf32>
    %96 = vector.broadcast %95 : vector<16x1xf32> to vector<16x128xf32>
    %97 = arith.mulf %96, %66 : vector<16x128xf32>
    %98 = arith.addf %93, %97 : vector<16x128xf32>
    %cst_25 = arith.constant 0.000000e+00 : f32
    %99 = vector.broadcast %cst_25 : f32 to vector<16x128xf32>
    %100 = arith.select %5, %99, %98 : vector<16x128xi1>, vector<16x128xf32>
    %101 = arith.mulf %100, %100 : vector<16x128xf32>
    %cst_26 = arith.constant dense<0.000000e+00> : vector<16xf32>
    %102 = vector.multi_reduction <add>, %101, %cst_26 [1] : vector<16x128xf32> to vector<16xf32>
    %103 = vector.shape_cast %102 : vector<16xf32> to vector<16x1xf32>
    %cst_27 = arith.constant 1.000000e+00 : f32
    %104 = vector.broadcast %cst_27 : f32 to vector<16x1xf32>
    %105 = arith.addf %104, %103 : vector<16x1xf32>
    %cst_28 = arith.constant 1.000000e-07 : f32
    %106 = vector.broadcast %cst_28 : f32 to vector<16x1xf32>
    %107 = arith.maximumf %105, %106 : vector<16x1xf32>
    %108 = math.sqrt %107 : vector<16x1xf32>
    %109 = vector.shape_cast %108 : vector<16x1xf32> to vector<16x1xf32>
    %110 = vector.broadcast %109 : vector<16x1xf32> to vector<16x128xf32>
    %111 = arith.select %5, %110, %98 : vector<16x128xi1>, vector<16x128xf32>
    %112 = vector.extract_strided_slice %111 {offsets = [0, 0], sizes = [16, 1], strides = [1, 1]} : vector<16x128xf32> to vector<16x1xf32>
    %cst_29 = arith.constant 0.000000e+00 : f32
    %113 = vector.broadcast %cst_29 : f32 to vector<16x128xf32>
    %114 = arith.select %5, %113, %111 : vector<16x128xi1>, vector<16x128xf32>
    %115 = arith.mulf %114, %114 : vector<16x128xf32>
    %cst_30 = arith.constant dense<0.000000e+00> : vector<16xf32>
    %116 = vector.multi_reduction <add>, %115, %cst_30 [1] : vector<16x128xf32> to vector<16xf32>
    %117 = vector.shape_cast %116 : vector<16xf32> to vector<16x1xf32>
    %118 = math.sqrt %117 : vector<16x1xf32>
    %cst_31 = arith.constant 1.000000e-15 : f32
    %119 = vector.broadcast %cst_31 : f32 to vector<16x1xf32>
    %120 = arith.maximumf %118, %119 : vector<16x1xf32>
    %cst_32 = arith.constant 1.00000012 : f32
    %121 = vector.broadcast %cst_32 : f32 to vector<16x1xf32>
    %122 = arith.maximumf %112, %121 : vector<16x1xf32>
    %123 = arith.mulf %122, %122 : vector<16x1xf32>
    %cst_33 = arith.constant 1.000000e+00 : f32
    %124 = vector.broadcast %cst_33 : f32 to vector<16x1xf32>
    %125 = arith.subf %123, %124 : vector<16x1xf32>
    %cst_34 = arith.constant 0.000000e+00 : f32
    %126 = vector.broadcast %cst_34 : f32 to vector<16x1xf32>
    %127 = arith.maximumf %125, %126 : vector<16x1xf32>
    %128 = math.sqrt %127 : vector<16x1xf32>
    %129 = arith.addf %122, %128 : vector<16x1xf32>
    %130 = math.log %129 : vector<16x1xf32>
    %131 = tpu.reciprocal %120 {approx = true} : vector<16x1xf32> -> vector<16x1xf32>
    %132 = arith.mulf %130, %131 : vector<16x1xf32>
    %133 = vector.broadcast %132 : vector<16x1xf32> to vector<16x128xf32>
    %134 = arith.mulf %133, %114 : vector<16x128xf32>
    %135 = arith.truncf %134 : vector<16x128xf32> to vector<16x128xbf16>
    %c0_35 = arith.constant 0 : index
    %c0_36 = arith.constant 0 : index
    %136 = vector.load %arg4[%c0_35, %c0_36] : memref<16x128xbf16, #tpu.memory_space<vmem>>, vector<16x128xbf16>
    tpu.vector_store %arg4[%c0_35, %c0_36], %135 {strides = array<i32>} : memref<16x128xbf16, #tpu.memory_space<vmem>>, vector<16x128xbf16>,
    return
  }
  func.func @transform_0(%arg0: i32) -> (i32, i32) {
    %c0_i32 = arith.constant 0 : i32
    %c0_i32_0 = arith.constant 0 : i32
    return %arg0, %c0_i32 : i32, i32
  }
  func.func @transform_1(%arg0: i32) -> (i32, i32) {
    %c0_i32 = arith.constant 0 : i32
    %c0_i32_0 = arith.constant 0 : i32
    %c0_i32_1 = arith.constant 0 : i32
    return %c0_i32, %c0_i32_0 : i32, i32
  }
  func.func @transform_2(%arg0: i32) -> (i32, i32) {
    %c0_i32 = arith.constant 0 : i32
    %c0_i32_0 = arith.constant 0 : i32
    %c0_i32_1 = arith.constant 0 : i32
    return %c0_i32, %c0_i32_0 : i32, i32
  }
  func.func @transform_3(%arg0: i32) -> (i32, i32) {
    %c0_i32 = arith.constant 0 : i32
    %c0_i32_0 = arith.constant 0 : i32
    return %arg0, %c0_i32 : i32, i32
  }
}

</mosaic_0001>

<bundles_post_ra>
// kernel: tpu_custom_call.1
= control target key start
LH: loop header
LB: loop body
LE: loop exit
PB: predicated region body
PF: predicated region fallthrough
CT: control target
= control target key end

     0   :  { %8 = vsyncpa [#allocation3], 0  ;;  %s1378_s0 = inlined_call_operand.hbm [shape: bf16[32,128], index: 0, kind: input, shape index: {}]   ;;  %s1379_s1 = inlined_call_operand.hbm [shape: bf16[128,128], index: 1, kind: input, shape index: {}]   ;;  %s1380_s2 = inlined_call_operand.vmem [shape: f32[1,128], index: 2, kind: input, shape index: {}]   ;;  %s1381_s3 = inlined_call_operand.hbm [shape: bf16[32,128], index: 3, kind: output, shape index: {}]  }
   0x1   :  { %10 = vsyncpa [#allocation3 + $0x1], 0 }
   0x2   :  { %11 = vsyncpa [#allocation6], 0 }
   0x3   :  { %12 = vsyncpa [#allocation4], 0 }
   0x4   :  { %14 = vsyncpa [#allocation4 + $0x1], 0  ;;  %s1098_s12 = smov 0   ;;  %s1100_s13 = smov 0  }
   0x5   :  { %s1102_s14 = smov 0   ;;  %s1104_s15 = smov 0  }
   0x6 LB: > { %s1119_s16 = sadd.s32 4294967295, %s1066_s15   ;;  %s731_s17 = sadd.s32 4294967294, %s1066_s15   ;;  %s1066_s15 = sphi %s1104_s15, %s1401_s15   ;;  %s1062_s14 = sphi %s1102_s14, %s1400_s14   ;;  %s1058_s13 = sphi %s1100_s13, %s1399_s13   ;;  %s1054_s12 = sphi %s1098_s12, %s1398_s12  }
   0x7   : > { %p40_p0 = scmp.ne.s32.totalorder %s1058_s13, %s1054_s12  ;;  %p1382_p1 = scmp.eq.s32.totalorder %s1119_s16, 0 }
   0x8   : > { %p112_p3 = scmp.eq.s32.totalorder %s731_s17, 1  ;;  %p732_p5 = scmp.ge.s32.totalorder %s1066_s15, 1 }
   0x9   : > { %p1128_p4 = por %p1382_p1, %p40_p0  ;;  %p119_p7 = scmp.lt.s32.totalorder %s1066_s15, 3 }
   0xa   : > { %p1133_p6 = por %p112_p3, %p40_p0  ;;  %s1068_s21 = smov [#allocation5]  }
   0xb   : > { %s1385_s18 = scalar_select %p1128_p4, 1, 0 }
   0xc   : > { %s1386_s19 = scalar_select %p1133_p6, 1, 0 }
   0xd   : > { %p1138_p8 = pnand %p732_p5, %p119_p7  ;;  %s131_s22 = sshll.u32 %s1068_s21, 4  ;;  %s1142_s22 = int_to_ptr.vmem [resolvable:$true] %s131_s22 }
   0xe   : > { %s1154_s24 = sadd.s32 1, %s1066_s15   ;;  %s27_s25 = sadd.s32 1, %s1062_s14 }
   0xf   : > { %s1387_s20 = scalar_select %p1138_p8, 1, 0 }
  0x10   : > { %p807_p9 = pneg %p1138_p8  ;;  %s24_s26 = ssub.s32 %s1066_s15, %s1154_s24 }
  0x11   : > { %s938_s29 = scalar_lea.hbm %s1379_s1, 1024 }
  0x12   : > { %p1149_p11 = pnand %p807_p9, %p1382_p1  ;;  %p939_p12 = scmp.ne.s32.totalorder %s1379_s1, %s938_s29 }
  0x13   : > { %p945_p5 = scmp.lt.u32.totalorder %s938_s29, %s1379_s1 }
  0x14   : > { %p940_p13 = pneg %p1149_p11 }
  0x16   : > { %p941_p0 = pnand %p940_p13, %p939_p12 }
  0x18   : > { %p942_p3 = pneg %p941_p0 }
  0x1a   : > { %p947_p7 = pnand %p945_p5, %p942_p3 }
  0x1c   : > { %950 = shalt.err (!%p947_p7)
}
  0x1d   : > { %s951_s7 = scalar_lea.vmem %s1142_s22, 1024  ;;  %p959_p2 = scmp.lt.s32.totalorder %s1142_s22, %s1142_s22 }
  0x1e   : > { %p952_p9 = scmp.ne.s32.totalorder %s1142_s22, %s951_s7  ;;  %p960_p6 = scmp.lt.s32.totalorder %s951_s7, %s951_s7 }
  0x20   : > { %p954_p10 = pnand %p952_p9, %p940_p13  ;;  %p961_p4 = por %p960_p6, %p959_p2 }
  0x22   : > { %p955_p1 = pneg %p954_p10 }
  0x24   : > { %p962_p8 = pnand %p961_p4, %p955_p1 }
  0x26   : > { %965 = shalt.err (!%p962_p8)
}
  0x27   : > { %s1069_s8 = smov 64   ;;  %s1070_s9 = smov 4  }
  0x28   : > { %810 = dma.hbm_to_vmem [thread:$0]  (!%p1149_p11), %s1379_s1, 1024, %s1142_s22, [#allocation6], %s1069_s8, %s1069_s8, %s1070_s9  }
  0x29   : > { %p25_p1 = scmp.eq.s32.totalorder %s24_s26, 0  ;;  %p34_p2 = scmp.ne.s32.totalorder %s1062_s14, %s1058_s13 }
  0x2a   : > { %p35_p4 = scmp.eq.s32.totalorder %s1066_s15, 0  ;;  %p820_p6 = scmp.lt.s32.totalorder %s1066_s15, 2 }
  0x2b   : > { %s1188_s17 = scalar_select %p25_p1, %s1062_s14, %s27_s25  }
  0x2c   : > { %p36_p8 = por %p35_p4, %p34_p2  ;;  %p1389_p10 = scmp.eq.s32.totalorder %s1119_s16, 1 }
  0x2d   : > { %s148_s23 = sand.u32 1, %s1062_s14   ;;  %s761_s27 = sshll.u32 %s1066_s15, 7 }
  0x2e   : > { %p1192_p12 = por %p1389_p10, %p34_p2  ;;  %s735_s28 = sshll.u32 %s148_s23, 3 }
  0x2f   : > { %s1201_s4 = scalar_lea.hbm %s1378_s0, %s761_s27  ;;  %s152_s22 = scalar_lea.vmem [#allocation2], %s735_s28 }
  0x30   : > { %s159_s25 = sshll.u32 %s152_s22, 4  ;;  %p1203_p11 = pnand %p820_p6, %p36_p8  ;;  %s1207_s25 = int_to_ptr.vmem [resolvable:$true] %s159_s25 }
  0x31   : > { %s1209_s5 = scalar_lea.sflag [#allocation3], %s148_s23  ;;  %s966_s6 = scalar_lea.hbm %s1201_s4, 128 }
  0x32   : > { %p967_p13 = scmp.ne.s32.totalorder %s1201_s4, %s966_s6  ;;  %p968_p0 = pneg %p1203_p11 }
  0x33   : > { %s971_s11 = scalar_lea.hbm %s1378_s0, 256  ;;  %p972_p7 = scmp.lt.u32.totalorder %s1201_s4, %s1378_s0 }
  0x34   : > { %p969_p3 = pnand %p968_p0, %p967_p13  ;;  %p973_p9 = scmp.lt.u32.totalorder %s971_s11, %s966_s6 }
  0x35   : > { %p975_p2 = scmp.lt.u32.totalorder %s966_s6, %s1201_s4 }
  0x36   : > { %p970_p5 = pneg %p969_p3  ;;  %p974_p1 = por %p973_p9, %p972_p7 }
  0x38   : > { %p976_p4 = por %p975_p2, %p974_p1 }
  0x3a   : > { %p977_p6 = pnand %p976_p4, %p970_p5 }
  0x3c   : > { %980 = shalt.err (!%p977_p6)
}
  0x3d   : > { %s981_s23 = scalar_lea.vmem %s1207_s25, 128  ;;  %s1071_s29 = smov [#allocation2]  }
  0x3e   : > { %p982_p8 = scmp.ne.s32.totalorder %s1207_s25, %s981_s23  ;;  %s986_s30 = sshll.u32 %s1071_s29, 4  ;;  %s987_s30 = int_to_ptr.vmem [resolvable:$false] %s986_s30 }
  0x3f   : > { %s988_s22 = scalar_lea.vmem %s987_s30, 256  ;;  %p989_p3 = scmp.lt.s32.totalorder %s1207_s25, %s987_s30 }
  0x40   : > { %p984_p10 = pnand %p982_p8, %p968_p0  ;;  %p990_p7 = scmp.lt.s32.totalorder %s988_s22, %s981_s23 }
  0x42   : > { %p985_p13 = pneg %p984_p10  ;;  %p991_p9 = por %p990_p7, %p989_p3 }
  0x44   : > { %p992_p1 = pnand %p991_p9, %p985_p13 }
  0x46   : > { %995 = shalt.err (!%p992_p1)
}
  0x47   : > { %814 = dma.hbm_to_vmem [thread:$0]  (!%p1203_p11), %s1201_s4, 128, %s1207_s25, %s1209_s5, %s1069_s8, %s1069_s8, %s1070_s9  }
  0x48   : > { %p1392_p0 = scmp.ne.s32.totalorder %s1387_s20, 0 }
  0x49   : > { %s1243_s6 = sand.u32 (!%p1392_p0), 1, %s1058_s13   ;;  %p1393_p5 = scmp.ne.s32.totalorder (!%p1392_p0), %s1385_s18, 0 }
  0x4a   : > { %171 = sbr.rel (%p1392_p0) target bundleno = 1646 (0x66e), region = 32  ;;  %s739_s7 = sshll.u32 (!%p1392_p0), %s1243_s6, 3 }
  0x4b   : > { %s174_s10 = scalar_lea.sflag (!%p1392_p0), [#allocation3], %s1243_s6  ;;  %s1249_s26 = scalar_lea.vmem (!%p1392_p0), [#allocation2], %s739_s7 }
  0x51   : > { %1041 = dma.done.wait (%p1393_p5), %s174_s10, 128  }
  0x52   : > { %1043 = vsyncadd (%p1393_p5), %s174_s10, 4294967168  ;;  %p1394_p11 = scmp.eq.s32.totalorder %s1119_s16, 0 }
  0x54   : > { %1045 = dma.done.wait (%p1394_p11), [#allocation6], 1024   ;;  %p1395_p2 = pmov %p1394_p11 }
  0x55   : > { %v1072_v0 = vmov 0.0   ;;  %vm1073_vm0 = vmmov 0   ;;  %v865_v1 = vld [vmem:[#allocation5] sm:$0xff]   ;;  %v866_v2 = vld [vmem:[#allocation5 + $0x8] sm:$0xff]   ;;  %v867_v3 = vld [vmem:[#allocation5 + $0x10] sm:$0xff]   ;;  %v226_v36 = vlaneseq  ;;  %v1074_v62 = vmov 0  }
  0x56   : > { %1047 = vsyncadd (%p1395_p2), [#allocation6], 4294966272  ;;  %779 = vmatprep.subr.bf16.mxu0 %v1072_v0  ;;  %795 = vmatprep.mubr.msk.bf16.mxu0 %vm1073_vm0, %v1072_v0  ;;  %v868_v4 = vld [vmem:[#allocation5 + $0x18] sm:$0xff]   ;;  %v869_v5 = vld [vmem:[#allocation5 + $0x20] sm:$0xff]   ;;  %s203_s8 = scalar_lea.vmem [#allocation7], %s739_s7  ;;  %s764_s4 = sshll.u32 %s1119_s16, 7 }
  0x57   : > { %780 = vmatpush3.bf16.msra.mxu0 %v865_v1  ;;  %v870_v6 = vld [vmem:[#allocation5 + $0x28] sm:$0xff]   ;;  %v871_v7 = vld [vmem:[#allocation5 + $0x30] sm:$0xff]   ;;  %v872_v8 = vld [vmem:[#allocation5 + $0x38] sm:$0xff]   ;;  %v1260_v42 = vand.u32 127, %v226_v36  ;;  %864 = vset.pattern.permute.xlu1 %v1074_v62  ;;  %s648_s9 = sshll.u32 %s203_s8, 4  ;;  %s1334_s11 = scalar_lea.hbm %s1381_s3, %s764_s4  ;;  %s1328_s9 = int_to_ptr.vmem [resolvable:$true] %s648_s9 }
  0x58   : > { %781 = vmatprep.subr.bf16.mxu0 %v1072_v0  ;;  %v873_v9 = vld [vmem:[%s1249_s26] sm:$0xff]   ;;  %863 = vset.pattern.permute.xlu0 %v1074_v62  ;;  %s635_s27 = scalar_lea.sflag [#allocation4], %s1243_s6  ;;  %s996_s28 = scalar_lea.vmem %s1328_s9, 128 }
  0x59   : > { %vm228_vm5 = vcmp.eq.s32.totalorder %v1260_v42, 0  ;;  %p997_p4 = scmp.ne.s32.totalorder %s1328_s9, %s996_s28  ;;  %s1075_s16 = smov [#allocation7]  }
  0x5a   : > { %s1000_s23 = sshll.u32 %s1075_s16, 4  ;;  %s1001_s23 = int_to_ptr.vmem [resolvable:$false] %s1000_s23 }
  0x5b   : > { %782 = vmatpush3.bf16.msra.mxu0 %v866_v2  ;;  %p998_p6 = pnand %p997_p4, %p1192_p12  ;;  %s1002_s29 = scalar_lea.vmem %s1001_s23, 256 }
  0x5c   : > { %783 = vmatprep.subr.bf16.mxu0 %v1072_v0  ;;  %p1003_p10 = scmp.lt.s32.totalorder %s1328_s9, %s1001_s23  ;;  %p1004_p13 = scmp.lt.s32.totalorder %s1002_s29, %s996_s28 }
  0x5d   : > { %p999_p8 = pneg %p998_p6 }
  0x5e   : > { %p1005_p3 = por %p1004_p13, %p1003_p10 }
  0x5f   : > { %784 = vmatpush3.bf16.msra.mxu0 %v867_v3 }
  0x60   : > { %785 = vmatprep.subr.bf16.mxu0 %v1072_v0  ;;  %p1006_p7 = pnand %p1005_p3, %p999_p8 }
  0x63   : > { %786 = vmatpush3.bf16.msra.mxu0 %v868_v4 }
  0x64   : > { %787 = vmatprep.subr.bf16.mxu0 %v1072_v0 }
  0x67   : > { %788 = vmatpush3.bf16.msra.mxu0 %v869_v5 }
  0x68   : > { %789 = vmatprep.subr.bf16.mxu0 %v1072_v0 }
  0x6b   : > { %790 = vmatpush3.bf16.msra.mxu0 %v870_v6 }
  0x6c   : > { %791 = vmatprep.subr.bf16.mxu0 %v1072_v0 }
  0x6f   : > { %792 = vmatpush3.bf16.msra.mxu0 %v871_v7 }
  0x70   : > { %793 = vmatprep.subr.bf16.mxu0 %v1072_v0 }
  0x73   : > { %794 = vmatpush3.bf16.msra.mxu0 %v872_v8 }
  0x76   : > { %796 = vmatmul.mubr.bf16.vlgmr.msra.gmra.mrb[0].mxu0 %v873_v9 }
 0x149   : > { %v317_v10 = vpop.f32.mrb[0].mxu0 }
 0x14a   : > { %v797_v11 = vpop.f32.mrb[1].mxu0  ;;  %v324_v12 = vmul.f32 %v317_v10, %v317_v10 }
 0x14b   : > { %v320_v13 = vpop.f32.mrb[2].mxu0 }
 0x14c   : > { %326 = vadd.xlane.f32.xlu0 %v324_v12  ;;  %v798_v14 = vpop.f32.mrb[3].mxu0  ;;  %v325_v15 = vmul.f32 %v320_v13, %v320_v13 }
 0x14d   : > { %v751_v14 = vld [vmem:[%s1380_s2] ss:$0 sm:$0xff] }
 0x150   : > { %328 = vadd.xlane.f32.xlu0 %v325_v15 }
 0x1d9   : > { %v327_v16 = vpop.xlane.xlu0 %326 }
 0x1da   : > { %874 = vrsqrt.f32 %v327_v16  ;;  %vm332_vm1 = vcmp.eq.f32.partialorder %v327_v16, inf  ;;  %v335_v20 = vand.u32 2147483648, %v327_v16  ;;  %vm334_vm2 = vcmp.eq.f32.partialorder %v327_v16, 0.0 }
 0x1dd   : > { %v329_v17 = vpop.xlane.xlu0 %328 }
 0x1de   : > { %876 = vrsqrt.f32 %v329_v17  ;;  %vm339_vm3 = vcmp.eq.f32.partialorder %v329_v17, inf  ;;  %v342_v26 = vand.u32 2147483648, %v329_v17  ;;  %vm341_vm4 = vcmp.eq.f32.partialorder %v329_v17, 0.0 }
 0x1e4   : > { %v875_v18 = vpop.eup %874 }
 0x1e5   : > { %v331_v19 = vmul.f32 %v875_v18, %v327_v16 }
 0x1e7   : > { %v333_v21 = vsel %vm332_vm1, %v327_v16, %v331_v19 }
 0x1e8   : > { %v877_v22 = vpop.eup %876  ;;  %v336_v23 = vsel %vm334_vm2, %v335_v20, %v333_v21 }
 0x1e9   : > { %v344_v24 = vmax.f32 %v336_v23, 1e-15  ;;  %v338_v25 = vmul.f32 %v877_v22, %v329_v17 }
 0x1eb   : > { %v348_v27 = vmul.f32 1.442695, %v344_v24  ;;  %v352_v28 = vsub.f32 0.0, %v344_v24  ;;  %v340_v29 = vsel %vm339_vm3, %v329_v17, %v338_v25 }
 0x1ec   : > { %v343_v30 = vsel %vm341_vm4, %v342_v26, %v340_v29 }
 0x1ed   : > { %v345_v31 = vmax.f32 %v343_v30, 1e-15  ;;  %v354_v32 = vmul.f32 1.442695, %v352_v28  ;;  %878 = vpow2.f32 %v348_v27 }
 0x1ef   : > { %v350_v33 = vmul.f32 1.442695, %v345_v31  ;;  %v353_v34 = vsub.f32 0.0, %v345_v31  ;;  %880 = vpow2.f32 %v354_v32 }
 0x1f0   : > { %882 = vrcp.f32 %v344_v24 }
 0x1f1   : > { %v356_v35 = vmul.f32 1.442695, %v353_v34  ;;  %884 = vpow2.f32 %v350_v33 }
 0x1f3   : > { %886 = vpow2.f32 %v356_v35 }
 0x1f4   : > { %888 = vrcp.f32 %v345_v31 }
 0x1f7   : > { %v879_v37 = vpop.eup %878 }
 0x1f9   : > { %v881_v38 = vpop.eup %880 }
 0x1fa   : > { %v358_v39 = vsub.f32 %v879_v37, %v881_v38  ;;  %v362_v40 = vadd.f32 %v881_v38, %v879_v37  ;;  %v883_v41 = vpop.eup %882 }
 0x1fb   : > { %v885_v43 = vpop.eup %884 }
 0x1fc   : > { %v360_v44 = vmul.f32 0.5, %v358_v39  ;;  %v364_v49 = vmul.f32 0.5, %v362_v40 }
 0x1fd   : > { %v887_v45 = vpop.eup %886 }
 0x1fe   : > { %v366_v46 = vmul.f32 %v883_v41, %v360_v44  ;;  %v359_v47 = vsub.f32 %v885_v43, %v887_v45  ;;  %v363_v48 = vadd.f32 %v887_v45, %v885_v43  ;;  %v889_v52 = vpop.eup %888 }
 0x200   : > { %v368_v50 = vmul.f32 %v366_v46, %v317_v10  ;;  %v361_v51 = vmul.f32 0.5, %v359_v47  ;;  %v365_v58 = vmul.f32 0.5, %v363_v48 }
 0x202   : > { %v372_v53 = vsel %vm228_vm5, 0.0, %v368_v50  ;;  %v1267_v54 = vsel %vm228_vm5, %v364_v49, %v368_v50  ;;  %v367_v55 = vmul.f32 %v889_v52, %v361_v51 }
 0x203   : > { %v374_v56 = vmul.f32 %v372_v53, %v372_v53  ;;  %v402_v21 = vsub.f32 1.0, %v1267_v54  ;;  %v438_v22 = vmax.f32 %v1267_v54, 1e-07 }
 0x204   : > { %v369_v57 = vmul.f32 %v367_v55, %v320_v13 }
 0x205   : > { %376 = vadd.xlane.f32.xlu1 %v374_v56 }
 0x206   : > { %v373_v59 = vsel %vm228_vm5, 0.0, %v369_v57  ;;  %v1273_v60 = vsel %vm228_vm5, %v365_v58, %v369_v57 }
 0x207   : > { %v375_v61 = vmul.f32 %v373_v59, %v373_v59  ;;  %v403_v20 = vsub.f32 1.0, %v1273_v60  ;;  %v439_v23 = vmax.f32 %v1273_v60, 1e-07 }
 0x209   : > { %378 = vadd.xlane.f32.xlu1 %v375_v61 }
 0x292   : > { %v377_v63 = vpop.xlane.xlu1 %376 }
 0x293   : > { %890 = vrsqrt.f32 %v377_v63  ;;  %vm382_vm6 = vcmp.eq.f32.partialorder %v377_v63, inf  ;;  %v385_v3 = vand.u32 2147483648, %v377_v63  ;;  %vm384_vm7 = vcmp.eq.f32.partialorder %v377_v63, 0.0 }
 0x296   : > { %v379_v0 = vpop.xlane.xlu1 %378 }
 0x297   : > { %892 = vrsqrt.f32 %v379_v0  ;;  %vm389_vm8 = vcmp.eq.f32.partialorder %v379_v0, inf  ;;  %v392_v9 = vand.u32 2147483648, %v379_v0  ;;  %vm391_vm9 = vcmp.eq.f32.partialorder %v379_v0, 0.0 }
 0x29d   : > { %v891_v1 = vpop.eup %890 }
 0x29e   : > { %v381_v2 = vmul.f32 %v891_v1, %v377_v63 }
 0x2a0   : > { %v383_v4 = vsel %vm382_vm6, %v377_v63, %v381_v2 }
 0x2a1   : > { %v893_v5 = vpop.eup %892  ;;  %v386_v6 = vsel %vm384_vm7, %v385_v3, %v383_v4 }
 0x2a2   : > { %v394_v7 = vmax.f32 %v386_v6, 1e-15  ;;  %v388_v8 = vmul.f32 %v893_v5, %v379_v0 }
 0x2a4   : > { %v390_v10 = vsel %vm389_vm8, %v379_v0, %v388_v8  ;;  %894 = vrcp.f32 %v394_v7  ;;  %v400_v37 = vsub.f32 0.0, %v394_v7 }
 0x2a5   : > { %v393_v11 = vsel %vm391_vm9, %v392_v9, %v390_v10 }
 0x2a6   : > { %v395_v12 = vmax.f32 %v393_v11, 1e-15 }
 0x2a8   : > { %896 = vrcp.f32 %v395_v12  ;;  %v401_v40 = vsub.f32 0.0, %v395_v12 }
 0x2a9   : > { %898 = vrcp.f32 %v438_v22 }
 0x2aa   : > { %900 = vrcp.f32 %v439_v23 }
 0x2ae   : > { %v895_v13 = vpop.eup %894 }
 0x2af   : > { %v398_v15 = vmul.f32 %v895_v13, %v372_v53 }
 0x2b1   : > { %v424_v16 = vmul.f32 %v751_v14, %v398_v15 }
 0x2b2   : > { %v897_v17 = vpop.eup %896 }
 0x2b3   : > { %426 = vadd.xlane.f32.xlu0 %v424_v16  ;;  %v399_v18 = vmul.f32 %v897_v17, %v373_v59  ;;  %v899_v27 = vpop.eup %898 }
 0x2b4   : > { %v901_v32 = vpop.eup %900 }
 0x2b5   : > { %v425_v19 = vmul.f32 %v751_v14, %v399_v18 }
 0x2b7   : > { %428 = vadd.xlane.f32.xlu1 %v425_v19 }
 0x2c8   : > { %411 = vperm.xlu1 %864, %v403_v20  }
 0x2c9   : > { %406 = vperm.xlu0 %863, %v402_v21  }
 0x340   : > { %v427_v24 = vpop.xlane.xlu0 %426 }
 0x341   : > { %v434_v25 = vmul.f32 %v427_v24, %v394_v7 }
 0x343   : > { %v436_v26 = vmul.f32 %v434_v25, %v1267_v54 }
 0x344   : > { %v429_v28 = vpop.xlane.xlu1 %428 }
 0x345   : > { %v435_v29 = vmul.f32 %v429_v28, %v395_v12  ;;  %v441_v30 = vmul.f32 %v899_v27, %v436_v26 }
 0x347   : > { %v437_v31 = vmul.f32 %v435_v29, %v1273_v60  ;;  %446 = vperm.xlu1 %864, %v441_v30  }
 0x348   : > { %v407_v34 = vpop.permute.xlu0 %406  ;;  %v412_v36 = vpop.permute.xlu1 %411 }
 0x349   : > { %v443_v33 = vmul.f32 %v901_v32, %v437_v31  ;;  %v414_v35 = vmul.f32 %v407_v34, %v398_v15  ;;  %v415_v38 = vmul.f32 %v412_v36, %v399_v18 }
 0x34b   : > { %451 = vperm.xlu1 %864, %v443_v33   ;;  %v416_v39 = vsel %vm228_vm5, %v400_v37, %v414_v35  ;;  %v417_v43 = vsel %vm228_vm5, %v401_v40, %v415_v38 }
 0x34c   : > { %v430_v41 = vmul.f32 %v427_v24, %v416_v39  ;;  %v431_v44 = vmul.f32 %v429_v28, %v417_v43 }
 0x34e   : > { %v432_v45 = vsub.f32 %v751_v14, %v430_v41  ;;  %v433_v49 = vsub.f32 %v751_v14, %v431_v44 }
 0x3c6   : > { %v447_v46 = vpop.permute.xlu1 %446 }
 0x3c7   : > { %v1290_v47 = vsel %vm228_vm5, %v447_v46, %v432_v45 }
 0x3c8   : > { %v456_v48 = vmul.f32 %v1290_v47, %v1290_v47  ;;  %v462_v53 = vmul.f32 2.0, %v1290_v47 }
 0x3ca   : > { %v452_v50 = vpop.permute.xlu1 %451  ;;  %458 = vadd.xlane.f32.xlu1 %v456_v48  ;;  %v464_v55 = vmul.f32 %v462_v53, %v1290_v47 }
 0x3cb   : > { %v1296_v51 = vsel %vm228_vm5, %v452_v50, %v433_v49 }
 0x3cc   : > { %v457_v52 = vmul.f32 %v1296_v51, %v1296_v51  ;;  %v463_v57 = vmul.f32 2.0, %v1296_v51 }
 0x3ce   : > { %460 = vadd.xlane.f32.xlu0 %v457_v52  ;;  %v465_v61 = vmul.f32 %v463_v57, %v1296_v51 }
 0x457   : > { %v459_v56 = vpop.xlane.xlu1 %458 }
 0x458   : > { %v466_v58 = vsub.f32 %v459_v56, %v464_v55 }
 0x45a   : > { %v468_v59 = vmax.f32 %v466_v58, 1e-07 }
 0x45b   : > { %v461_v62 = vpop.xlane.xlu0 %460 }
 0x45c   : > { %902 = vrsqrt.f32 %v468_v59  ;;  %v467_v63 = vsub.f32 %v461_v62, %v465_v61  ;;  %vm472_vm10 = vcmp.eq.f32.partialorder %v468_v59, inf  ;;  %v475_v3 = vand.u32 2147483648, %v468_v59 }
 0x45d   : > { %vm474_vm11 = vcmp.eq.f32.partialorder %v468_v59, 0.0 }
 0x45e   : > { %v469_v0 = vmax.f32 %v467_v63, 1e-07 }
 0x460   : > { %904 = vrsqrt.f32 %v469_v0  ;;  %vm479_vm12 = vcmp.eq.f32.partialorder %v469_v0, inf  ;;  %v482_v9 = vand.u32 2147483648, %v469_v0  ;;  %vm481_vm13 = vcmp.eq.f32.partialorder %v469_v0, 0.0 }
 0x466   : > { %v903_v1 = vpop.eup %902 }
 0x467   : > { %v471_v2 = vmul.f32 %v903_v1, %v468_v59 }
 0x469   : > { %v473_v4 = vsel %vm472_vm10, %v468_v59, %v471_v2 }
 0x46a   : > { %v476_v5 = vsel %vm474_vm11, %v475_v3, %v473_v4  ;;  %v905_v6 = vpop.eup %904 }
 0x46b   : > { %v484_v7 = vmin.f32 %v476_v5, 1000000.0  ;;  %v478_v8 = vmul.f32 %v905_v6, %v469_v0 }
 0x46d   : > { %v486_v10 = vmax.f32 %v484_v7, 1e-15  ;;  %v480_v11 = vsel %vm479_vm12, %v469_v0, %v478_v8 }
 0x46e   : > { %v483_v14 = vsel %vm481_vm13, %v482_v9, %v480_v11 }
 0x46f   : > { %v488_v12 = vmul.f32 1.442695, %v486_v10  ;;  %v492_v13 = vsub.f32 0.0, %v486_v10  ;;  %v485_v15 = vmin.f32 %v483_v14, 1000000.0 }
 0x471   : > { %v494_v16 = vmul.f32 1.442695, %v492_v13  ;;  %906 = vpow2.f32 %v488_v12  ;;  %v487_v17 = vmax.f32 %v485_v15, 1e-15 }
 0x473   : > { %908 = vpow2.f32 %v494_v16  ;;  %v490_v18 = vmul.f32 1.442695, %v487_v17  ;;  %v493_v19 = vsub.f32 0.0, %v487_v17 }
 0x475   : > { %v496_v20 = vmul.f32 1.442695, %v493_v19  ;;  %910 = vpow2.f32 %v490_v18 }
 0x477   : > { %912 = vpow2.f32 %v496_v20 }
 0x478   : > { %914 = vrcp.f32 %v486_v10 }
 0x479   : > { %916 = vrcp.f32 %v487_v17 }
 0x47b   : > { %v907_v21 = vpop.eup %906 }
 0x47d   : > { %v909_v22 = vpop.eup %908 }
 0x47e   : > { %v502_v23 = vadd.f32 %v909_v22, %v907_v21  ;;  %v498_v24 = vsub.f32 %v907_v21, %v909_v22 }
 0x47f   : > { %v911_v27 = vpop.eup %910 }
 0x480   : > { %v504_v25 = vmul.f32 0.5, %v502_v23  ;;  %v500_v26 = vmul.f32 0.5, %v498_v24 }
 0x481   : > { %v913_v28 = vpop.eup %912 }
 0x482   : > { %508 = vperm.xlu1 %864, %v504_v25   ;;  %v915_v29 = vpop.eup %914  ;;  %v503_v30 = vadd.f32 %v913_v28, %v911_v27  ;;  %v499_v31 = vsub.f32 %v911_v27, %v913_v28 }
 0x483   : > { %v520_v32 = vmul.f32 %v915_v29, %v500_v26  ;;  %v917_v35 = vpop.eup %916 }
 0x484   : > { %v505_v33 = vmul.f32 0.5, %v503_v30  ;;  %v501_v34 = vmul.f32 0.5, %v499_v31 }
 0x486   : > { %524 = vperm.xlu1 %864, %v520_v32   ;;  %513 = vperm.xlu0 %863, %v505_v33   ;;  %v521_v36 = vmul.f32 %v917_v35, %v501_v34 }
 0x48a   : > { %529 = vperm.xlu1 %864, %v521_v36  }
 0x501   : > { %v509_v37 = vpop.permute.xlu1 %508 }
 0x502   : > { %v516_v39 = vmul.f32 %v509_v37, %v1267_v54 }
 0x505   : > { %v525_v38 = vpop.permute.xlu1 %524  ;;  %v514_v41 = vpop.permute.xlu0 %513 }
 0x506   : > { %v532_v40 = vmul.f32 %v525_v38, %v1290_v47  ;;  %v517_v45 = vmul.f32 %v514_v41, %v1273_v60 }
 0x508   : > { %v534_v43 = vadd.f32 %v532_v40, %v516_v39 }
 0x509   : > { %v530_v44 = vpop.permute.xlu1 %529 }
 0x50a   : > { %v533_v46 = vmul.f32 %v530_v44, %v1296_v51  ;;  %v1310_v48 = vsel %vm228_vm5, 0.0, %v534_v43 }
 0x50b   : > { %v538_v49 = vmul.f32 %v1310_v48, %v1310_v48 }
 0x50c   : > { %v535_v50 = vadd.f32 %v533_v46, %v517_v45 }
 0x50d   : > { %540 = vadd.xlane.f32.xlu1 %v538_v49 }
 0x50e   : > { %v1316_v54 = vsel %vm228_vm5, 0.0, %v535_v50 }
 0x50f   : > { %v539_v47 = vmul.f32 %v1316_v54, %v1316_v54 }
 0x511   : > { %542 = vadd.xlane.f32.xlu0 %v539_v47 }
 0x59a   : > { %v541_v60 = vpop.xlane.xlu1 %540 }
 0x59b   : > { %v544_v52 = vadd.f32 1.0, %v541_v60  ;;  %vm566_vm2 = vcmp.eq.f32.partialorder %v541_v60, inf  ;;  %v569_v19 = vand.u32 2147483648, %v541_v60  ;;  %vm568_vm3 = vcmp.eq.f32.partialorder %v541_v60, 0.0 }
 0x59d   : > { %v546_v51 = vmax.f32 %v544_v52, 1e-07 }
 0x59e   : > { %v543_v53 = vpop.xlane.xlu0 %542 }
 0x59f   : > { %v545_v55 = vadd.f32 1.0, %v543_v53  ;;  %918 = vrsqrt.f32 %v546_v51  ;;  %vm550_vm14 = vcmp.eq.f32.partialorder %v546_v51, inf  ;;  %v553_v59 = vand.u32 2147483648, %v546_v51 }
 0x5a0   : > { %vm552_vm15 = vcmp.eq.f32.partialorder %v546_v51, 0.0  ;;  %vm573_vm4 = vcmp.eq.f32.partialorder %v543_v53, inf  ;;  %v576_v25 = vand.u32 2147483648, %v543_v53  ;;  %vm575_vm7 = vcmp.eq.f32.partialorder %v543_v53, 0.0 }
 0x5a1   : > { %v547_v56 = vmax.f32 %v545_v55, 1e-07 }
 0x5a3   : > { %920 = vrsqrt.f32 %v547_v56  ;;  %vm557_vm0 = vcmp.eq.f32.partialorder %v547_v56, inf  ;;  %v560_v2 = vand.u32 2147483648, %v547_v56  ;;  %vm559_vm1 = vcmp.eq.f32.partialorder %v547_v56, 0.0 }
 0x5a4   : > { %922 = vrsqrt.f32 %v541_v60 }
 0x5a5   : > { %924 = vrsqrt.f32 %v543_v53 }
 0x5a9   : > { %v919_v57 = vpop.eup %918 }
 0x5aa   : > { %v549_v58 = vmul.f32 %v919_v57, %v546_v51 }
 0x5ac   : > { %v551_v62 = vsel %vm550_vm14, %v546_v51, %v549_v58 }
 0x5ad   : > { %v921_v61 = vpop.eup %920  ;;  %v554_v63 = vsel %vm552_vm15, %v553_v59, %v551_v62 }
 0x5ae   : > { %v556_v0 = vmul.f32 %v921_v61, %v547_v56  ;;  %v562_v1 = vsel %vm228_vm5, %v554_v63, %v534_v43  ;;  %v923_v13 = vpop.eup %922 }
 0x5af   : > { %v580_v3 = vmax.f32 %v562_v1, 1.0000001  ;;  %v565_v15 = vmul.f32 %v923_v13, %v541_v60  ;;  %v925_v16 = vpop.eup %924 }
 0x5b0   : > { %v558_v4 = vsel %vm557_vm0, %v547_v56, %v556_v0  ;;  %v572_v18 = vmul.f32 %v925_v16, %v543_v53 }
 0x5b1   : > { %v561_v5 = vsel %vm559_vm1, %v560_v2, %v558_v4  ;;  %v582_v6 = vmul.f32 %v580_v3, %v580_v3  ;;  %v567_v17 = vsel %vm566_vm2, %v541_v60, %v565_v15 }
 0x5b2   : > { %v563_v7 = vsel %vm228_vm5, %v561_v5, %v535_v50  ;;  %v570_v42 = vsel %vm568_vm3, %v569_v19, %v567_v17  ;;  %v574_v22 = vsel %vm573_vm4, %v543_v53, %v572_v18 }
 0x5b3   : > { %v581_v8 = vmax.f32 %v563_v7, 1.0000001  ;;  %v752_v9 = vadd.f32 -1.0, %v582_v6  ;;  %v578_v27 = vmax.f32 %v570_v42, 1e-15  ;;  %v577_v31 = vsel %vm575_vm7, %v576_v25, %v574_v22 }
 0x5b4   : > { %v579_v35 = vmax.f32 %v577_v31, 1e-15 }
 0x5b5   : > { %v583_v10 = vmul.f32 %v581_v8, %v581_v8  ;;  %v586_v11 = vmax.f32 %v752_v9, 0.0 }
 0x5b7   : > { %v753_v12 = vadd.f32 -1.0, %v583_v10  ;;  %926 = vrsqrt.f32 %v586_v11  ;;  %vm590_vm5 = vcmp.eq.f32.partialorder %v586_v11, inf  ;;  %v593_v23 = vand.u32 2147483648, %v586_v11 }
 0x5b8   : > { %vm592_vm6 = vcmp.eq.f32.partialorder %v586_v11, 0.0 }
 0x5b9   : > { %v587_v14 = vmax.f32 %v753_v12, 0.0 }
 0x5bb   : > { %928 = vrsqrt.f32 %v587_v14  ;;  %vm597_vm8 = vcmp.eq.f32.partialorder %v587_v14, inf  ;;  %v600_v32 = vand.u32 2147483648, %v587_v14  ;;  %vm599_vm9 = vcmp.eq.f32.partialorder %v587_v14, 0.0 }
 0x5c1   : > { %v927_v20 = vpop.eup %926 }
 0x5c2   : > { %v589_v21 = vmul.f32 %v927_v20, %v586_v11 }
 0x5c4   : > { %v591_v26 = vsel %vm590_vm5, %v586_v11, %v589_v21 }
 0x5c5   : > { %v929_v24 = vpop.eup %928  ;;  %v594_v28 = vsel %vm592_vm6, %v593_v23, %v591_v26 }
 0x5c6   : > { %v596_v29 = vmul.f32 %v929_v24, %v587_v14  ;;  %v602_v30 = vadd.f32 %v594_v28, %v580_v3 }
 0x5c8   : > { %v598_v33 = vsel %vm597_vm8, %v587_v14, %v596_v29  ;;  %930 = vlog2.f32 %v602_v30 }
 0x5c9   : > { %v601_v34 = vsel %vm599_vm9, %v600_v32, %v598_v33  ;;  %932 = vrcp.f32 %v578_v27 }
 0x5ca   : > { %v603_v36 = vadd.f32 %v601_v34, %v581_v8 }
 0x5cc   : > { %934 = vlog2.f32 %v603_v36 }
 0x5cd   : > { %936 = vrcp.f32 %v579_v35 }
 0x5d2   : > { %v931_v37 = vpop.eup %930 }
 0x5d3   : > { %v605_v38 = vmul.f32 0.6931472, %v931_v37  ;;  %v933_v39 = vpop.eup %932 }
 0x5d5   : > { %v610_v41 = vmul.f32 %v933_v39, %v605_v38 }
 0x5d6   : > { %v935_v40 = vpop.eup %934 }
 0x5d7   : > { %v607_v43 = vmul.f32 0.6931472, %v935_v40  ;;  %v937_v44 = vpop.eup %936  ;;  %614 = vperm.xlu1 %864, %v610_v41  }
 0x5d9   : > { %v611_v45 = vmul.f32 %v937_v44, %v607_v43 }
 0x5db   : > { %619 = vperm.xlu0 %863, %v611_v45  }
 0x656   : > { %v615_v46 = vpop.permute.xlu1 %614 }
 0x657   : > { %v622_v50 = vmul.f32 %v615_v46, %v1310_v48 }
 0x65a   : > { %v620_v49 = vpop.permute.xlu0 %619 }
 0x65b   : > { %v623_v47 = vmul.f32 %v620_v49, %v1316_v54 }
 0x65d   : > { %v768_v60 = vpack.c.bf16 %v623_v47, %v622_v50 }
 0x65f   : > { %769 = vst [vmem:[%s203_s8] sm:$0xff] %v768_v60  }
 0x660   : > { %1009 = shalt.err (!%p1006_p7)
}
 0x661   : > { %s1010_s30 = scalar_lea.hbm %s1334_s11, 128  ;;  %s1014_s10 = scalar_lea.hbm %s1381_s3, 256 }
 0x662   : > { %p1011_p9 = scmp.ne.s32.totalorder %s1334_s11, %s1010_s30  ;;  %p1015_p5 = scmp.lt.u32.totalorder %s1334_s11, %s1381_s3 }
 0x663   : > { %p1016_p11 = scmp.lt.u32.totalorder %s1014_s10, %s1010_s30  ;;  %p1018_p4 = scmp.lt.u32.totalorder %s1010_s30, %s1334_s11 }
 0x664   : > { %p1012_p1 = pnand %p1011_p9, %p1192_p12 }
 0x665   : > { %p1017_p2 = por %p1016_p11, %p1015_p5 }
 0x666   : > { %p1013_p0 = pneg %p1012_p1 }
 0x667   : > { %p1019_p6 = por %p1018_p4, %p1017_p2 }
 0x669   : > { %p1020_p8 = pnand %p1019_p6, %p1013_p0 }
 0x66b   : > { %1023 = shalt.err (!%p1020_p8)
}
 0x66c   : > { %s1076_s20 = smov 64   ;;  %s1077_s8 = smov 4  }
 0x66d   : > { %805 = dma.vmem_to_hbm [thread:$0]  (%p1192_p12), %s1328_s9, 128, %s1334_s11, %s635_s27, %s1076_s20, %s1076_s20, %s1077_s8  }
 0x66e PF: > { %s663_s4 = sand.u32 1, %s1054_s12   ;;  %p1396_p10 = scmp.ne.s32.totalorder %s1386_s19, 0 }
 0x66f   : > { %p1397_p13 = scmp.ge.s32.totalorder %s1066_s15, 2  ;;  %s664_s25 = scalar_lea.sflag [#allocation4], %s663_s4 }
 0x671   : > { %p816_p3 = pnand %p1397_p13, %p1396_p10 }
 0x673   : > { %1049 = dma.done.wait (!%p816_p3), %s664_s25, 128  }
 0x674   : > { %1051 = vsyncadd (!%p816_p3), %s664_s25, 4294967168  ;;  %p17_p7 = scmp.ge.s32.totalorder %s1154_s24, 4   ;;  %s1398_s12 = smov %s1058_s13 }
 0x675   : > { %s1399_s13 = smov %s1062_s14  ;;  %s1400_s14 = smov %s1188_s17 }
 0x676   : > { %s1401_s15 = smov %s1154_s24  ;;  %19 = sbr.rel (!%p17_p7) target bundleno = 6 (0x6), region = 81 }
 0x67d   :  { %669 = vsyncpa [#allocation3], 1 }
 0x67e   :  { %671 = vsyncpa [#allocation3 + $0x1], 1 }
 0x67f   :  { %672 = vsyncpa [#allocation6], 1 }
 0x680   :  { %673 = vsyncpa [#allocation4], 1 }
 0x681   :  { %675 = vsyncpa [#allocation4 + $0x1], 1 }

</bundles_post_ra>
